<compile_context>
chip_gen: v6e
topology: v6e:2x2x1
jax: 0.10.0
libtpu: 0.0.40
codegen_flags: <defaults>
</compile_context>

<pallas_src>
import jax
import jax.numpy as jnp
from jax.experimental import pallas as pl
from jax.experimental.pallas import tpu as pltpu


def _gelu_tanh(x):
    # gelu_new / tanh approximation, matching HF GPT-2's default activation.
    c = jnp.sqrt(2.0 / jnp.pi).astype(x.dtype)
    return 0.5 * x * (1.0 + jnp.tanh(c * (x + 0.044715 * x * x * x)))


def _round_up(n, m):
    return ((n + m - 1) // m) * m


# --------------------------- kernels ---------------------------------------

def mlp_kernel_fused(x_ref, w1_ref, b1_ref, w2_ref, b2_ref, o_ref):
    # Single grid axis over token tiles; the whole intermediate dim is resident.
    # x_ref: (tm, D); w1_ref: (D, I); b1_ref: (1, I); w2_ref: (I, D);
    # b2_ref: (1, D); o_ref: (tm, D)
    h = jnp.dot(x_ref[...], w1_ref[...], preferred_element_type=jnp.float32)
    h = _gelu_tanh(h + b1_ref[...].astype(jnp.float32))
    y = jnp.dot(h.astype(w2_ref.dtype), w2_ref[...],
                preferred_element_type=jnp.float32)
    o_ref[...] = (y + b2_ref[...].astype(jnp.float32)).astype(o_ref.dtype)


def mlp_kernel_acc(x_ref, w1_ref, b1_ref, w2_ref, b2_ref, o_ref, acc_ref):
    # Grid: (M tiles, I tiles).  I is streamed with an f32 VMEM accumulator.
    k = pl.program_id(1)

    @pl.when(k == 0)
    def _init():
        acc_ref[...] = jnp.zeros_like(acc_ref)

    h = jnp.dot(x_ref[...], w1_ref[...], preferred_element_type=jnp.float32)
    h = _gelu_tanh(h + b1_ref[...].astype(jnp.float32))
    acc_ref[...] += jnp.dot(h.astype(w2_ref.dtype), w2_ref[...],
                            preferred_element_type=jnp.float32)

    @pl.when(k == pl.num_programs(1) - 1)
    def _finalize():
        o_ref[...] = (acc_ref[...] + b2_ref[...].astype(jnp.float32)).astype(
            o_ref.dtype)


# ----------------------- tile / VMEM sizing --------------------------------

def _vmem_info():
    """Physical VMEM per core (generation-aware), and whether it was detected."""
    cap = None
    try:
        info = pltpu.get_tpu_info()
        cap = getattr(info, "vmem_capacity_bytes", None)
    except Exception:
        cap = None
    detected = bool(cap)
    if not detected:
        cap = 64 * 1024 * 1024  # conservative fallback: v7x per-core VMEM
    return int(cap), detected


def _footprint_bytes(tm, ti, D, x_isz, w_isz, multi_k, sub_align):
    """Per-step VMEM working set: each pipelined operand counted once per buffer
    (x2 for default double-buffering, no extra doubling), plus scratch and the
    in-kernel f32 intermediates of x@W1 / gelu / cast."""
    tm_l = _round_up(tm, sub_align)
    ti_l = _round_up(ti, 128)
    d_l = _round_up(D, 128)
    fp = 2 * tm_l * d_l * x_isz            # x tile (2 buffers)
    fp += 2 * d_l * ti_l * w_isz           # W1 tile
    fp += 2 * ti_l * w_isz                 # b1 tile
    fp += 2 * ti_l * d_l * w_isz           # W2 tile
    fp += 2 * d_l * w_isz                  # b2
    fp += 2 * tm_l * d_l * x_isz           # out tile
    fp += 3 * tm_l * ti_l * 4              # h intermediates (pre/post GELU, cast)
    if multi_k:
        fp += tm_l * d_l * 4               # f32 accumulator scratch
    return fp


def _tm_candidates(M, sub_align, tm_req):
    cap = min(_round_up(tm_req, sub_align), _round_up(M, sub_align))
    cands = []
    t = max(cap, sub_align)
    while t >= sub_align:
        cands.append(t)
        if t == sub_align:
            break
        nt = _round_up(t // 2, sub_align)
        t = nt if nt < t else t - sub_align
    return cands


def _ti_candidates(I, ti_req):
    if ti_req is not None:
        return [int(ti_req)]
    cands = [I]                                  # full I -> fused kernel, no pad
    if I % 128 == 0:
        n = I // 128
        for d in range(n - 1, 0, -1):            # 128-multiple divisors of I
            ti = d * 128
            if I % ti == 0:
                cands.append(ti)
    else:
        # Last-resort padded chunks (only hit when I is both huge and not a
        # multiple of 128).
        t = ((I - 1) // 128) * 128
        while t >= 128:
            cands.append(t)
            t = (t // 2 // 128) * 128
    return cands


def _select_tiles(M, D, I, x_isz, w_isz, sub_align, budget, tm_req, ti_req):
    tm_cands = _tm_candidates(M, sub_align, tm_req)
    ti_cands = _ti_candidates(I, ti_req)
    # Priority: largest tm (weight-streaming arithmetic intensity), then the
    # largest ti that still fits the VMEM budget at that tm.
    for tm_c in tm_cands:
        for ti_c in ti_cands:
            multi_k = ti_c < I
            if _footprint_bytes(tm_c, min(ti_c, I), D, x_isz, w_isz, multi_k,
                                sub_align) <= budget:
                return tm_c, ti_c
    # Nothing fits (pathological widths) -> smallest tiles.
    # TODO(synk): add a third grid axis over D for very large model widths.
    return tm_cands[-1], ti_cands[-1]


# ------------------------------ wrapper -------------------------------------

def gpt_mlp_1d(x, w1, b1, w2, b2, *, tm=1024, ti=None):
    """x: [B, S, D]; w1: [D, I]; b1: [I]; w2: [I, D]; b2: [D].

    Weights are stored pre-transposed ([in, out], i.e. W^T of torch.nn.Linear).
    ti=None -> auto (full I when it fits VMEM, else a 128-multiple chunk).
    """
    B, S, D = x.shape
    Din, I = w1.shape
    assert Din == D and w2.shape == (I, D) and b1.shape == (I,) and b2.shape == (D,)
    M = B * S

    x_isz = jnp.dtype(x.dtype).itemsize
    w_isz = jnp.dtype(w1.dtype).itemsize
    # bf16 packs 2 rows per sublane -> 16-row alignment; f32 needs 8.
    sub_align = 16 if x_isz == 2 else 8

    cap, detected = _vmem_info()
    budget = int(0.75 * cap)

    tm_eff, ti_eff = _select_tiles(M, D, I, x_isz, w_isz, sub_align, budget,
                                   tm, ti)

    # Megacore (v7x-like, 64 MiB/core, 2 TCs): keep >= 2 M-tiles so the
    # "parallel" axis shards across both TensorCores.
    if detected and cap <= 96 * 1024 * 1024 and M >= 512:
        if _round_up(M, tm_eff) // tm_eff < 2:
            tm_eff = _round_up(-(-M // 2), sub_align)

    Mp = _round_up(M, tm_eff)
    x2d = x.reshape(M, D)
    if Mp != M:
        x2d = jnp.pad(x2d, ((0, Mp - M), (0, 0)))

    multi_k = ti_eff < I
    if multi_k:
        n_k = -(-I // ti_eff)
        Ip = n_k * ti_eff
        if Ip != I:
            # Rare fallback; zero-padded W2 rows contribute 0 to the accumulator.
            w1 = jnp.pad(w1, ((0, 0), (0, Ip - I)))
            b1 = jnp.pad(b1, ((0, Ip - I),))
            w2 = jnp.pad(w2, ((0, Ip - I), (0, 0)))
    else:
        n_k, Ip = 1, I
        ti_eff = I

    b1_2d = b1.reshape(1, Ip)
    b2_2d = b2.reshape(1, D)

    n_m = Mp // tm_eff
    vmem_limit = int(min(0.8 * cap, cap - 4 * 1024 * 1024))

    cost = pl.CostEstimate(
        flops=4 * M * D * I,                 # two matmuls, 2*M*D*I each
        transcendentals=M * I,               # tanh in GELU
        bytes_accessed=int(x2d.size * x_isz + Mp * D * x_isz
                           + n_m * (w1.size + w2.size + b1.size) * w_isz
                           + b2.size * w_isz),
    )

    if multi_k:
        grid_spec = pltpu.PrefetchScalarGridSpec(
            num_scalar_prefetch=0,
            grid=(n_m, n_k),
            in_specs=[
                pl.BlockSpec((tm_eff, D), lambda i, k: (i, 0)),    # x tile
                pl.BlockSpec((D, ti_eff), lambda i, k: (0, k)),    # W1[:, k-tile]
                pl.BlockSpec((1, ti_eff), lambda i, k: (0, k)),    # b1[k-tile]
                pl.BlockSpec((ti_eff, D), lambda i, k: (k, 0)),    # W2[k-tile, :]
                pl.BlockSpec((1, D), lambda i, k: (0, 0)),         # b2
            ],
            out_specs=pl.BlockSpec((tm_eff, D), lambda i, k: (i, 0)),
            scratch_shapes=[pltpu.VMEM((tm_eff, D), jnp.float32)],
        )
        kernel = mlp_kernel_acc
        dims = ("parallel", "arbitrary")
    else:
        grid_spec = pltpu.PrefetchScalarGridSpec(
            num_scalar_prefetch=0,
            grid=(n_m,),
            in_specs=[
                pl.BlockSpec((tm_eff, D), lambda i: (i, 0)),       # x tile
                pl.BlockSpec((D, I), lambda i: (0, 0)),            # W1 (resident)
                pl.BlockSpec((1, I), lambda i: (0, 0)),            # b1
                pl.BlockSpec((I, D), lambda i: (0, 0)),            # W2 (resident)
                pl.BlockSpec((1, D), lambda i: (0, 0)),            # b2
            ],
            out_specs=pl.BlockSpec((tm_eff, D), lambda i: (i, 0)),
            scratch_shapes=[],
        )
        kernel = mlp_kernel_fused
        dims = ("parallel",)

    out = pl.pallas_call(
        kernel,
        out_shape=jax.ShapeDtypeStruct((Mp, D), x.dtype),
        grid_spec=grid_spec,
        compiler_params=pltpu.CompilerParams(
            dimension_semantics=dims,
            vmem_limit_bytes=vmem_limit,
        ),
        cost_estimate=cost,
    )(x2d, w1, b1_2d, w2, b2_2d)

    return out[:M].reshape(B, S, D)


# ------------------------------ reference / tests ---------------------------

def reference_mlp(x, w1, b1, w2, b2):
    h = jnp.einsum("bsd,di->bsi", x, w1) + b1
    h = _gelu_tanh(h)
    return jnp.einsum("bsi,id->bsd", h, w2) + b2


def _make_params(key, B, S, D, mlp_ratio, dtype):
    I = int(D * mlp_ratio)
    kx, kw1, kb1, kw2, kb2 = jax.random.split(key, 5)
    x = jax.random.normal(kx, (B, S, D), dtype=jnp.float32).astype(dtype)
    w1 = (jax.random.normal(kw1, (D, I), dtype=jnp.float32) * 0.02).astype(dtype)
    b1 = (jax.random.normal(kb1, (I,), dtype=jnp.float32) * 0.02).astype(dtype)
    w2 = (jax.random.normal(kw2, (I, D), dtype=jnp.float32) * 0.02).astype(dtype)
    b2 = (jax.random.normal(kb2, (D,), dtype=jnp.float32) * 0.02).astype(dtype)
    return x, w1, b1, w2, b2


if __name__ == "__main__":
    key = jax.random.PRNGKey(0)

    # 1) f32 correctness at the small module-consistent shape (dim=32, ratio=4).
    B, S, D, ratio = 2, 8, 32, 4.0
    x, w1, b1, w2, b2 = _make_params(key, B, S, D, ratio, jnp.float32)
    y = jax.block_until_ready(gpt_mlp_1d(x, w1, b1, w2, b2))
    y_ref = reference_mlp(x, w1, b1, w2, b2)
    assert y.shape == (B, S, D)
    assert jnp.allclose(y, y_ref, atol=1e-5, rtol=1e-5), "f32 mismatch vs reference"

    # 2) Ragged token count (M not a multiple of the tile) exercises M padding.
    xr, w1r, b1r, w2r, b2r = _make_params(jax.random.PRNGKey(1), 3, 5, D, ratio,
                                          jnp.float32)
    yr = jax.block_until_ready(gpt_mlp_1d(xr, w1r, b1r, w2r, b2r))
    yr_ref = reference_mlp(xr, w1r, b1r, w2r, b2r)
    assert jnp.allclose(yr, yr_ref, atol=1e-5, rtol=1e-5), "ragged mismatch"

    # 3) bf16 path (MXU-friendly dtype; f32 accumulation inside the kernel).
    xb, w1b, b1b, w2b, b2b = (a.astype(jnp.bfloat16) for a in (x, w1, b1, w2, b2))
    yb = jax.block_until_ready(gpt_mlp_1d(xb, w1b, b1b, w2b, b2b))
    assert jnp.allclose(yb.astype(jnp.float32), y_ref, atol=2e-2, rtol=2e-2), \
        "bf16 mismatch vs reference"

    # 4) Streaming-I accumulator fallback (forced small ti) on a larger shape.
    xs, w1s, b1s, w2s, b2s = _make_params(jax.random.PRNGKey(2), 2, 24, 128, 4.0,
                                          jnp.float32)
    ys = jax.block_until_ready(gpt_mlp_1d(xs, w1s, b1s, w2s, b2s, ti=128))
    ys_ref = reference_mlp(xs, w1s, b1s, w2s, b2s)
    assert jnp.allclose(ys, ys_ref, atol=5e-4, rtol=5e-4), "streaming-I mismatch"

    print("KERNEL_OK")
</pallas_src>

<mosaic_0001>
module attributes {stable_mosaic.version = 11 : i64} {
  func.func @mlp_kernel_fused(%arg0: i32, %arg1: memref<16x32xf32, #tpu.memory_space<vmem>>, %arg2: memref<32x128xf32, #tpu.memory_space<vmem>>, %arg3: memref<1x128xf32, #tpu.memory_space<vmem>>, %arg4: memref<128x32xf32, #tpu.memory_space<vmem>>, %arg5: memref<1x32xf32, #tpu.memory_space<vmem>>, %arg6: memref<16x32xf32, #tpu.memory_space<vmem>>) attributes {dimension_semantics = [#tpu.dimension_semantics<parallel>], iteration_bounds = array<i64: 1>, scalar_prefetch = 0 : i64, scratch_operands = 0 : i64, tpu.core_type = #tpu.core_type<tc>, window_params = [{transform_indices = @transform_0, window_bounds = array<i64: 16, 32>}, {pipeline_mode = #tpu.pipeline_mode<synchronous>, transform_indices = @transform_1, window_bounds = array<i64: 32, 128>}, {pipeline_mode = #tpu.pipeline_mode<synchronous>, transform_indices = @transform_2, window_bounds = array<i64: 1, 128>}, {pipeline_mode = #tpu.pipeline_mode<synchronous>, transform_indices = @transform_3, window_bounds = array<i64: 128, 32>}, {pipeline_mode = #tpu.pipeline_mode<synchronous>, transform_indices = @transform_4, window_bounds = array<i64: 1, 32>}, {transform_indices = @transform_5, window_bounds = array<i64: 16, 32>}]} {
    %c0 = arith.constant 0 : index
    %c0_0 = arith.constant 0 : index
    %0 = vector.load %arg1[%c0, %c0_0] : memref<16x32xf32, #tpu.memory_space<vmem>>, vector<16x32xf32>
    %c0_1 = arith.constant 0 : index
    %c0_2 = arith.constant 0 : index
    %1 = vector.load %arg2[%c0_1, %c0_2] : memref<32x128xf32, #tpu.memory_space<vmem>>, vector<32x128xf32>
    %cst = arith.constant dense<0.000000e+00> : vector<16x128xf32>
    %2 = tpu.matmul %0, %1, %cst {dimension_numbers = #tpu.dot_dimension_numbers<[1], [0], [0], [1], [0, 0, 1, 1], [], []>} : vector<16x32xf32>, vector<32x128xf32>, vector<16x128xf32> -> vector<16x128xf32>
    %c0_3 = arith.constant 0 : index
    %c0_4 = arith.constant 0 : index
    %3 = vector.load %arg3[%c0_3, %c0_4] : memref<1x128xf32, #tpu.memory_space<vmem>>, vector<1x128xf32>
    %4 = vector.broadcast %3 : vector<1x128xf32> to vector<16x128xf32>
    %5 = arith.addf %2, %4 : vector<16x128xf32>
    %cst_5 = arith.constant 0.636619746 : f32
    %6 = math.sqrt %cst_5 : f32
    %cst_6 = arith.constant 5.000000e-01 : f32
    %7 = vector.broadcast %cst_6 : f32 to vector<16x128xf32>
    %8 = arith.mulf %7, %5 : vector<16x128xf32>
    %cst_7 = arith.constant 4.471500e-02 : f32
    %9 = vector.broadcast %cst_7 : f32 to vector<16x128xf32>
    %10 = arith.mulf %9, %5 : vector<16x128xf32>
    %11 = arith.mulf %10, %5 : vector<16x128xf32>
    %12 = arith.mulf %11, %5 : vector<16x128xf32>
    %13 = arith.addf %5, %12 : vector<16x128xf32>
    %14 = vector.broadcast %6 : f32 to vector<16x128xf32>
    %15 = arith.mulf %14, %13 : vector<16x128xf32>
    %16 = math.tanh %15 : vector<16x128xf32>
    %cst_8 = arith.constant 1.000000e+00 : f32
    %17 = vector.broadcast %cst_8 : f32 to vector<16x128xf32>
    %18 = arith.addf %17, %16 : vector<16x128xf32>
    %19 = arith.mulf %8, %18 : vector<16x128xf32>
    %c0_9 = arith.constant 0 : index
    %c0_10 = arith.constant 0 : index
    %20 = vector.load %arg4[%c0_9, %c0_10] : memref<128x32xf32, #tpu.memory_space<vmem>>, vector<128x32xf32>
    %cst_11 = arith.constant dense<0.000000e+00> : vector<16x32xf32>
    %21 = tpu.matmul %19, %20, %cst_11 {dimension_numbers = #tpu.dot_dimension_numbers<[1], [0], [0], [1], [0, 0, 1, 1], [], []>} : vector<16x128xf32>, vector<128x32xf32>, vector<16x32xf32> -> vector<16x32xf32>
    %c0_12 = arith.constant 0 : index
    %c0_13 = arith.constant 0 : index
    %22 = vector.load %arg5[%c0_12, %c0_13] : memref<1x32xf32, #tpu.memory_space<vmem>>, vector<1x32xf32>
    %23 = vector.broadcast %22 : vector<1x32xf32> to vector<16x32xf32>
    %24 = arith.addf %21, %23 : vector<16x32xf32>
    %c0_14 = arith.constant 0 : index
    %c0_15 = arith.constant 0 : index
    %25 = vector.load %arg6[%c0_14, %c0_15] : memref<16x32xf32, #tpu.memory_space<vmem>>, vector<16x32xf32>
    tpu.vector_store %arg6[%c0_14, %c0_15], %24 {strides = array<i32>} : memref<16x32xf32, #tpu.memory_space<vmem>>, vector<16x32xf32>,
    return
  }
  func.func @transform_0(%arg0: i32) -> (i32, i32) {
    %c0_i32 = arith.constant 0 : i32
    %c0_i32_0 = arith.constant 0 : i32
    return %arg0, %c0_i32 : i32, i32
  }
  func.func @transform_1(%arg0: i32) -> (i32, i32) {
    %c0_i32 = arith.constant 0 : i32
    %c0_i32_0 = arith.constant 0 : i32
    %c0_i32_1 = arith.constant 0 : i32
    return %c0_i32, %c0_i32_0 : i32, i32
  }
  func.func @transform_2(%arg0: i32) -> (i32, i32) {
    %c0_i32 = arith.constant 0 : i32
    %c0_i32_0 = arith.constant 0 : i32
    %c0_i32_1 = arith.constant 0 : i32
    return %c0_i32, %c0_i32_0 : i32, i32
  }
  func.func @transform_3(%arg0: i32) -> (i32, i32) {
    %c0_i32 = arith.constant 0 : i32
    %c0_i32_0 = arith.constant 0 : i32
    %c0_i32_1 = arith.constant 0 : i32
    return %c0_i32, %c0_i32_0 : i32, i32
  }
  func.func @transform_4(%arg0: i32) -> (i32, i32) {
    %c0_i32 = arith.constant 0 : i32
    %c0_i32_0 = arith.constant 0 : i32
    %c0_i32_1 = arith.constant 0 : i32
    return %c0_i32, %c0_i32_0 : i32, i32
  }
  func.func @transform_5(%arg0: i32) -> (i32, i32) {
    %c0_i32 = arith.constant 0 : i32
    %c0_i32_0 = arith.constant 0 : i32
    return %arg0, %c0_i32 : i32, i32
  }
}

</mosaic_0001>

<bundles_post_ra>
// kernel: tpu_custom_call.1
= control target key start
LH: loop header
LB: loop body
LE: loop exit
PB: predicated region body
PF: predicated region fallthrough
CT: control target
= control target key end

     0   :  { %vm34_vm0 = vcmask 261120   ;;  %s465_s0 = inlined_call_operand.vmem [shape: f32[16,32], index: 0, kind: input, shape index: {}]   ;;  %s466_s1 = inlined_call_operand.vmem [shape: f32[32,128], index: 1, kind: input, shape index: {}]   ;;  %s467_s2 = inlined_call_operand.vmem [shape: f32[1,128], index: 2, kind: input, shape index: {}]   ;;  %s468_s3 = inlined_call_operand.vmem [shape: f32[128,32], index: 3, kind: input, shape index: {}]   ;;  %s469_s4 = inlined_call_operand.vmem [shape: f32[1,32], index: 4, kind: input, shape index: {}]   ;;  %s470_s5 = inlined_call_operand.hbm [shape: f32[16,32], index: 5, kind: output, shape index: {}]  }
   0x1   :  { %v26_v0 = vld [vmem:[%s466_s1 + $0x18] sm:$0xff]  ;;  %v25_v1 = vld [vmem:[%s466_s1 + $0x10] sm:$0xff]  ;;  %v21_v2 = vld [vmem:[%s465_s0] sm:$0xff] }
   0x2   :  { %278 = vmatprep.subr.mxu0 %v26_v0  ;;  %v24_v3 = vld [vmem:[%s466_s1 + $0x8] sm:$0xff]  ;;  %286 = vmatprep.mubr.msk.f32.mxu0 %vm34_vm0, %v21_v2 }
   0x3   :  { %279 = vmatpush3.msra.mxu0 %v26_v0 }
   0x4   :  { %10 = vsyncpa [#allocation3], 0  ;;  %280 = vmatprep.subr.mxu0 %v25_v1  ;;  %v23_v4 = vld [vmem:[%s466_s1] sm:$0xff]  ;;  %v22_v5 = vld [vmem:[%s465_s0 + $0x8] sm:$0xff]  ;;  %s353_s10 = smov [#allocation2]  }
   0x5   :  { %281 = vmatpush3.msra.mxu0 %v25_v1  ;;  %v149_v6 = vld [vmem:[%s468_s3 + $0x78] sm:$0xff]  ;;  %v148_v7 = vld [vmem:[%s468_s3 + $0x70] sm:$0xff]  ;;  %v147_v8 = vld [vmem:[%s468_s3 + $0x68] sm:$0xff]  ;;  %s239_s11 = sshll.u32 %s353_s10, 4  ;;  %s240_s11 = int_to_ptr.vmem [resolvable:$true] %s239_s11 }
   0x6   :  { %282 = vmatprep.subr.mxu0 %v24_v3  ;;  %289 = vmatprep.subr.mxu1 %v149_v6  ;;  %v146_v9 = vld [vmem:[%s468_s3 + $0x60] sm:$0xff]  ;;  %v145_v10 = vld [vmem:[%s468_s3 + $0x58] sm:$0xff]  ;;  %v144_v11 = vld [vmem:[%s468_s3 + $0x50] sm:$0xff]  ;;  %s331_s12 = scalar_lea.vmem %s240_s11, 256  ;;  %p336_p1 = scmp.lt.s32.totalorder %s240_s11, %s240_s11 }
   0x7   :  { %283 = vmatpush3.msra.mxu0 %v24_v3  ;;  %290 = vmatpush3.msra.mxu1 %v149_v6  ;;  %v143_v12 = vld [vmem:[%s468_s3 + $0x48] sm:$0xff]  ;;  %v142_v13 = vld [vmem:[%s468_s3 + $0x40] sm:$0xff]  ;;  %v141_v14 = vld [vmem:[%s468_s3 + $0x38] sm:$0xff]  ;;  %p332_p0 = scmp.ne.s32.totalorder %s240_s11, %s331_s12  ;;  %p337_p2 = scmp.lt.s32.totalorder %s331_s12, %s331_s12 }
   0x8   :  { %284 = vmatprep.subr.mxu0 %v23_v4  ;;  %291 = vmatprep.subr.mxu1 %v148_v7  ;;  %v140_v15 = vld [vmem:[%s468_s3 + $0x30] sm:$0xff]  ;;  %v139_v16 = vld [vmem:[%s468_s3 + $0x28] sm:$0xff]  ;;  %v138_v17 = vld [vmem:[%s468_s3 + $0x20] sm:$0xff] }
   0x9   :  { %285 = vmatpush3.msra.mxu0 %v23_v4  ;;  %292 = vmatpush3.msra.mxu1 %v148_v7  ;;  %v137_v18 = vld [vmem:[%s468_s3 + $0x18] sm:$0xff]  ;;  %v136_v19 = vld [vmem:[%s468_s3 + $0x10] sm:$0xff]  ;;  %v135_v20 = vld [vmem:[%s468_s3 + $0x8] sm:$0xff]  ;;  %p338_p3 = por %p337_p2, %p336_p1 }
   0xa   :  { %287 = vmatmul.mubr.msk.f32.vlgmr.msra.gmra.mxu0 %vm34_vm0, %v22_v5  ;;  %293 = vmatprep.subr.mxu1 %v147_v8  ;;  %v134_v21 = vld [vmem:[%s468_s3] sm:$0xff] }
   0xb   :  { %294 = vmatpush3.msra.mxu1 %v147_v8  ;;  %v250_v22 = vld [vmem:[%s467_s2] ss:$0 sm:$0xff]  ;;  %p339_p4 = pnand %p338_p3, %p332_p0 }
   0xc   :  { %295 = vmatprep.subr.mxu1 %v146_v9  ;;  %v253_v45 = vld [vmem:[%s469_s4] ss:$0 sm:$0xff] }
   0xd   :  { %296 = vmatpush3.msra.mxu1 %v146_v9 }
   0xe   :  { %297 = vmatprep.subr.mxu1 %v145_v10 }
   0xf   :  { %298 = vmatpush3.msra.mxu1 %v145_v10 }
  0x10   :  { %299 = vmatprep.subr.mxu1 %v144_v11 }
  0x11   :  { %300 = vmatpush3.msra.mxu1 %v144_v11 }
  0x12   :  { %301 = vmatprep.subr.mxu1 %v143_v12 }
  0x13   :  { %302 = vmatpush3.msra.mxu1 %v143_v12 }
  0x14   :  { %303 = vmatprep.subr.mxu1 %v142_v13 }
  0x15   :  { %304 = vmatpush3.msra.mxu1 %v142_v13 }
  0x16   :  { %305 = vmatprep.subr.mxu1 %v141_v14 }
  0x17   :  { %306 = vmatpush3.msra.mxu1 %v141_v14 }
  0x18   :  { %307 = vmatprep.subr.mxu1 %v140_v15 }
  0x19   :  { %308 = vmatpush3.msra.mxu1 %v140_v15 }
  0x1a   :  { %309 = vmatprep.subr.mxu1 %v139_v16 }
  0x1b   :  { %310 = vmatpush3.msra.mxu1 %v139_v16 }
  0x1c   :  { %311 = vmatprep.subr.mxu1 %v138_v17 }
  0x1d   :  { %312 = vmatpush3.msra.mxu1 %v138_v17 }
  0x1e   :  { %313 = vmatprep.subr.mxu1 %v137_v18 }
  0x1f   :  { %314 = vmatpush3.msra.mxu1 %v137_v18 }
  0x20   :  { %315 = vmatprep.subr.mxu1 %v136_v19 }
  0x21   :  { %316 = vmatpush3.msra.mxu1 %v136_v19 }
  0x22   :  { %317 = vmatprep.subr.mxu1 %v135_v20 }
  0x23   :  { %318 = vmatpush3.msra.mxu1 %v135_v20 }
  0x24   :  { %319 = vmatprep.subr.mxu1 %v134_v21 }
  0x25   :  { %320 = vmatpush3.msra.mxu1 %v134_v21 }
  0xca   :  { %v288_v23 = vpop.f32.mrf.mxu0 }
  0xcb   :  { %v113_v24 = vadd.f32 %v288_v23, %v250_v22 }
  0xcc   :  { %v107_v25 = vpop.f32.mrf.mxu0 }
  0xcd   :  { %v119_v26 = vmul.f32 0.044715, %v113_v24  ;;  %v108_v27 = vadd.f32 %v250_v22, %v107_v25  ;;  %v117_v42 = vmul.f32 0.5, %v113_v24 }
  0xcf   :  { %v121_v28 = vmul.f32 %v119_v26, %v113_v24  ;;  %v118_v29 = vmul.f32 0.044715, %v108_v27  ;;  %v116_v40 = vmul.f32 0.5, %v108_v27 }
  0xd1   :  { %v120_v30 = vmul.f32 %v118_v29, %v108_v27  ;;  %v123_v31 = vmul.f32 %v121_v28, %v113_v24 }
  0xd3   :  { %v122_v32 = vmul.f32 %v120_v30, %v108_v27  ;;  %v125_v33 = vadd.f32 %v123_v31, %v113_v24 }
  0xd5   :  { %v124_v34 = vadd.f32 %v122_v32, %v108_v27  ;;  %v127_v35 = vmul.f32 0.7978845, %v125_v33 }
  0xd7   :  { %v126_v36 = vmul.f32 0.7978845, %v124_v34  ;;  %327 = vtanh.f32 %v127_v35 }
  0xd9   :  { %329 = vtanh.f32 %v126_v36 }
  0xe4   :  { %v328_v37 = vpop.eup %327 }
  0xe5   :  { %v131_v39 = vadd.f32 1.0, %v328_v37 }
  0xe6   :  { %v330_v38 = vpop.eup %329 }
  0xe7   :  { %v130_v41 = vadd.f32 1.0, %v330_v38  ;;  %v133_v44 = vmul.f32 %v131_v39, %v117_v42 }
  0xe9   :  { %v132_v43 = vmul.f32 %v130_v41, %v116_v40 }
  0xeb   :  { %321 = vmatprep.mubr.f32.mxu1 %v132_v43 }
  0xec   :  { %322 = vmatmul.mubr.f32.vlgmr.msra.gmra.mxu1 %v133_v44 }
 0x1ac   :  { %v323_v46 = vpop.f32.mrf.mxu1 }
 0x1ad   :  { %v229_v47 = vadd.f32 %v323_v46, %v253_v45 }
 0x1ae   :  { %v223_v48 = vpop.f32.mrf.mxu1 }
 0x1af   :  { %233 = vst.msk [vmem:[#allocation2 + $0x8] sm:$0xff] %vm34_vm0, %v229_v47  ;;  %v224_v49 = vadd.f32 %v253_v45, %v223_v48 }
 0x1b1   :  { %232 = vst.msk [vmem:[#allocation2] sm:$0xff] %vm34_vm0, %v224_v49 }
 0x1b2   :  { %342 = shalt.err (!%p339_p4)
}
 0x1b3   :  { %s354_s13 = smov 128   ;;  %s355_s4 = smov 8  }
 0x1b4   :  { %245 = dma.vmem_to_hbm [thread:$0]  %s240_s11, 256, %s470_s5, [#allocation3], %s354_s13, %s354_s13, %s355_s4  }
 0x1b5   :  { %351 = dma.done.wait [#allocation3], 256  }
 0x1b6   :  { %352 = vsyncadd [#allocation3], 4294967040 }
 0x1b7   :  { %249 = vsyncpa [#allocation3], 1 }

</bundles_post_ra>
